<compile_context>
chip_gen: v7x
topology: tpu7x:2x2x1
jax: 0.10.0
libtpu: 0.0.40
codegen_flags: <defaults>
</compile_context>

<pallas_src>
import jax
import jax.numpy as jnp
from jax.experimental import pallas as pl
from jax.experimental.pallas import tpu as pltpu


def _mlp_kernel(x_ref, w1_ref, b1_ref, w2_ref, b2_ref, w3_ref, b3_ref, o_ref):
    """One batch tile: x (TB, d0) -> sigmoid output (TB, 1)."""
    cdt = w1_ref.dtype                                   # matmul operand dtype

    x = x_ref[...]                                       # (TB, d0), already cdt

    # layer 0: Linear(d0, d1) + ReLU  (bf16 operands, f32 accumulation on MXU)
    h1 = jnp.dot(x, w1_ref[...], preferred_element_type=jnp.float32) + b1_ref[...]
    h1 = jnp.maximum(h1, 0.0)

    # layer 1: Linear(d1, d2) + ReLU
    h2 = jnp.dot(h1.astype(cdt), w2_ref[...],
                 preferred_element_type=jnp.float32) + b2_ref[...]
    h2 = jnp.maximum(h2, 0.0)

    # layer 2: Linear(d2, 1) done on the VPU/XLU (broadcast-multiply + lane
    # reduce) in full f32 — avoids an MXU weight reload and any h2 transpose.
    z = jnp.sum(h2 * w3_ref[...], axis=1, keepdims=True) + b3_ref[...]   # (TB, 1)

    # numerically stable sigmoid: exp() only ever sees non-positive arguments.
    e = jnp.exp(-jnp.abs(z))
    sig = jnp.where(z >= 0, 1.0 / (1.0 + e), e / (1.0 + e))
    o_ref[...] = sig.astype(o_ref.dtype)


def _round_up(x, m):
    return ((x + m - 1) // m) * m


def active_learning_forward(x, params, *, block_batch=4096,
                            compute_dtype=jnp.bfloat16):
    """Forward pass. x: anything flattening to (-1, in_dim). Returns (batch, 1) f32.

    compute_dtype controls only the matmul operand dtype (accumulation, biases,
    ReLU, final layer and sigmoid are always f32).  bf16 is the throughput
    default (mandatory-grade on v5e); pass jnp.float32 for exact parity.
    """
    w1, b1, w2, b2, w3, b3 = params
    d0, d1 = w1.shape
    d2 = w2.shape[1]

    # Single wrapper-side pass over the pool: reshape + cast straight to the
    # matmul operand dtype.
    x2d = jnp.asarray(x).reshape(-1, d0).astype(compute_dtype)
    batch = x2d.shape[0]

    if batch >= block_batch:
        # Large pool: no jnp.pad — Pallas masks the partial boundary block
        # (OOB reads are row-local garbage sliced off below; OOB writes dropped).
        tb = block_batch
        n_tiles = pl.cdiv(batch, tb)
        # v7x megacore: an odd tile count leaves one TensorCore idle for the
        # last tile; shrink the tile to split the batch evenly (harmless on
        # v5e/v6e). Keep tiles >= 256 rows so per-step overhead stays amortized.
        if n_tiles > 1 and n_tiles % 2 == 1:
            tb_even = _round_up(pl.cdiv(batch, n_tiles + 1), 8)
            if tb_even >= 256:
                tb = tb_even
        rows = batch
    else:
        # Tiny pool (< one tile): one exact tile; pad only to 8-row sublane
        # alignment (a few rows of a small array — negligible copy).
        tb = max(_round_up(batch, 8), 8)
        if tb != batch:
            x2d = jnp.pad(x2d, ((0, tb - batch), (0, 0)))
        rows = tb

    n_tiles = pl.cdiv(rows, tb)

    # Weights/biases: tiny, VMEM-resident for the whole grid (constant index maps).
    w1c = w1.astype(compute_dtype)
    w2c = w2.astype(compute_dtype)
    b1r = b1.reshape(1, d1).astype(jnp.float32)
    b2r = b2.reshape(1, d2).astype(jnp.float32)
    w3r = w3.reshape(1, d2).astype(jnp.float32)     # final layer stays f32
    b3r = b3.reshape(1, 1).astype(jnp.float32)

    # VMEM footprint at TB=4096 (bf16): x double-buffer 0.5 MiB + h1/h2/layer-3
    # temporaries ~2 MiB + weights <0.1 MiB  ->  well under the 32 MiB scoped
    # default on every generation (v7x's 64 MiB physical included).
    # TODO(synk): sub-tile the body with lax.fori_loop(unroll=True) only if a
    # bundle dump shows ld/st slot_util > ~50% after the bf16 switch.
    out = pl.pallas_call(
        _mlp_kernel,
        out_shape=jax.ShapeDtypeStruct((rows, 1), jnp.float32),
        grid=(n_tiles,),
        in_specs=[
            pl.BlockSpec((tb, d0), lambda i: (i, 0)),   # x: streamed batch tiles
            pl.BlockSpec((d0, d1), lambda i: (0, 0)),   # w1: resident
            pl.BlockSpec((1, d1), lambda i: (0, 0)),    # b1
            pl.BlockSpec((d1, d2), lambda i: (0, 0)),   # w2
            pl.BlockSpec((1, d2), lambda i: (0, 0)),    # b2
            pl.BlockSpec((1, d2), lambda i: (0, 0)),    # w3 (as a row, f32)
            pl.BlockSpec((1, 1), lambda i: (0, 0)),     # b3
        ],
        out_specs=pl.BlockSpec((tb, 1), lambda i: (i, 0)),
        compiler_params=pltpu.CompilerParams(
            dimension_semantics=("parallel",)),          # megacore split on v7x
    )(x2d, w1c, b1r, w2c, b2r, w3r, b3r)

    return out[:batch]


def init_params(key, layers_size):
    """Deterministic init mirroring nn.Linear parameter shapes.
    PyTorch weight is (out, in); we store the transpose (in, out)."""
    d0, d1, d2 = layers_size
    ks = jax.random.split(key, 6)

    def lin(kw, kb, fan_in, fan_out):
        bound = 1.0 / jnp.sqrt(fan_in)
        w = jax.random.uniform(kw, (fan_in, fan_out), jnp.float32, -bound, bound)
        b = jax.random.uniform(kb, (1, fan_out), jnp.float32, -bound, bound)
        return w, b

    w1, b1 = lin(ks[0], ks[1], d0, d1)   # _input : Linear(d0, d1)
    w2, b2 = lin(ks[2], ks[3], d1, d2)   # _layer1: Linear(d1, d2)
    w3, b3 = lin(ks[4], ks[5], d2, 1)    # _layer2: Linear(d2, 1)
    return (w1, b1, w2, b2, w3, b3)


def reference_forward(x, params):
    w1, b1, w2, b2, w3, b3 = params
    x2d = x.reshape(-1, w1.shape[0]).astype(jnp.float32)
    h = jax.nn.relu(x2d @ w1 + b1)
    h = jax.nn.relu(h @ w2 + b2)
    return jax.nn.sigmoid(h @ w3 + b3)


if __name__ == "__main__":
    # TODO(synk): the Adam optimizer held in __init__ is training-only state; the
    # forward-pass kernel does not model it.
    layers_size = [32, 64, 32]          # (in_dim, hidden1, hidden2) -> output dim 1
    key = jax.random.PRNGKey(0)
    k_params, k_x1, k_x2 = jax.random.split(key, 3)

    params = init_params(k_params, layers_size)

    # Small shape mirroring x.view(-1, in_dim): (2, 4, 32) -> (8, 32)
    x_small = jax.random.normal(k_x1, (2, 4, 32), jnp.float32)
    ref_small = reference_forward(x_small, params)

    # f32 exact-parity path (small, single exact tile).
    out_f32_small = jax.block_until_ready(
        active_learning_forward(x_small, params, compute_dtype=jnp.float32))
    assert out_f32_small.shape == (8, 1), out_f32_small.shape
    assert jnp.allclose(out_f32_small, ref_small, atol=1e-5, rtol=1e-5), \
        "mismatch (f32, small)"

    # Ragged 2500-row pool.
    x_big = jax.random.normal(k_x2, (2500, 32), jnp.float32)
    ref_big = reference_forward(x_big, params)

    # f32, default tile (single padded tile path).
    out_f32_big = jax.block_until_ready(
        active_learning_forward(x_big, params, compute_dtype=jnp.float32))
    assert out_f32_big.shape == (2500, 1), out_f32_big.shape
    assert jnp.allclose(out_f32_big, ref_big, atol=1e-5, rtol=1e-5), \
        "mismatch (f32, single-tile)"

    # f32, small tile -> multi-tile grid, no-pad partial boundary block,
    # even-tile-count heuristic exercised.
    out_f32_multi = jax.block_until_ready(
        active_learning_forward(x_big, params, block_batch=512,
                                compute_dtype=jnp.float32))
    assert out_f32_multi.shape == (2500, 1), out_f32_multi.shape
    assert jnp.allclose(out_f32_multi, ref_big, atol=1e-5, rtol=1e-5), \
        "mismatch (f32, multi-tile)"

    # Default bf16 throughput path (f32 accumulation; loose tolerance is the
    # documented precision/throughput tradeoff for acquisition scoring).
    out_bf16_small = jax.block_until_ready(active_learning_forward(x_small, params))
    assert out_bf16_small.shape == (8, 1), out_bf16_small.shape
    assert jnp.allclose(out_bf16_small, ref_small, atol=3e-2, rtol=0.0), \
        "mismatch (bf16, small)"

    out_bf16_big = jax.block_until_ready(active_learning_forward(x_big, params))
    assert out_bf16_big.shape == (2500, 1), out_bf16_big.shape
    assert jnp.allclose(out_bf16_big, ref_big, atol=3e-2, rtol=0.0), \
        "mismatch (bf16, big)"

    print("KERNEL_OK")
</pallas_src>

<mosaic_0001>
module attributes {stable_mosaic.version = 11 : i64} {
  func.func @_mlp_kernel(%arg0: i32, %arg1: memref<8x32xf32, #tpu.memory_space<vmem>>, %arg2: memref<32x64xf32, #tpu.memory_space<vmem>>, %arg3: memref<1x64xf32, #tpu.memory_space<vmem>>, %arg4: memref<64x32xf32, #tpu.memory_space<vmem>>, %arg5: memref<1x32xf32, #tpu.memory_space<vmem>>, %arg6: memref<1x32xf32, #tpu.memory_space<vmem>>, %arg7: memref<1x1xf32, #tpu.memory_space<vmem>>, %arg8: memref<8x1xf32, #tpu.memory_space<vmem>>) attributes {dimension_semantics = [#tpu.dimension_semantics<parallel>], iteration_bounds = array<i64: 1>, scalar_prefetch = 0 : i64, scratch_operands = 0 : i64, tpu.core_type = #tpu.core_type<tc>, window_params = [{transform_indices = @transform_0, window_bounds = array<i64: 8, 32>}, {pipeline_mode = #tpu.pipeline_mode<synchronous>, transform_indices = @transform_1, window_bounds = array<i64: 32, 64>}, {pipeline_mode = #tpu.pipeline_mode<synchronous>, transform_indices = @transform_2, window_bounds = array<i64: 1, 64>}, {pipeline_mode = #tpu.pipeline_mode<synchronous>, transform_indices = @transform_3, window_bounds = array<i64: 64, 32>}, {pipeline_mode = #tpu.pipeline_mode<synchronous>, transform_indices = @transform_4, window_bounds = array<i64: 1, 32>}, {pipeline_mode = #tpu.pipeline_mode<synchronous>, transform_indices = @transform_5, window_bounds = array<i64: 1, 32>}, {pipeline_mode = #tpu.pipeline_mode<synchronous>, transform_indices = @transform_6, window_bounds = array<i64: 1, 1>}, {transform_indices = @transform_7, window_bounds = array<i64: 8, 1>}]} {
    %c0 = arith.constant 0 : index
    %c0_0 = arith.constant 0 : index
    %0 = vector.load %arg1[%c0, %c0_0] : memref<8x32xf32, #tpu.memory_space<vmem>>, vector<8x32xf32>
    %c0_1 = arith.constant 0 : index
    %c0_2 = arith.constant 0 : index
    %1 = vector.load %arg2[%c0_1, %c0_2] : memref<32x64xf32, #tpu.memory_space<vmem>>, vector<32x64xf32>
    %cst = arith.constant dense<0.000000e+00> : vector<8x64xf32>
    %2 = tpu.matmul %0, %1, %cst {dimension_numbers = #tpu.dot_dimension_numbers<[1], [0], [0], [1], [0, 0, 1, 1], [], []>} : vector<8x32xf32>, vector<32x64xf32>, vector<8x64xf32> -> vector<8x64xf32>
    %c0_3 = arith.constant 0 : index
    %c0_4 = arith.constant 0 : index
    %3 = vector.load %arg3[%c0_3, %c0_4] : memref<1x64xf32, #tpu.memory_space<vmem>>, vector<1x64xf32>
    %4 = vector.broadcast %3 : vector<1x64xf32> to vector<8x64xf32>
    %5 = arith.addf %2, %4 : vector<8x64xf32>
    %cst_5 = arith.constant 0.000000e+00 : f32
    %6 = vector.broadcast %cst_5 : f32 to vector<8x64xf32>
    %7 = arith.maximumf %5, %6 : vector<8x64xf32>
    %c0_6 = arith.constant 0 : index
    %c0_7 = arith.constant 0 : index
    %8 = vector.load %arg4[%c0_6, %c0_7] : memref<64x32xf32, #tpu.memory_space<vmem>>, vector<64x32xf32>
    %cst_8 = arith.constant dense<0.000000e+00> : vector<8x32xf32>
    %9 = tpu.matmul %7, %8, %cst_8 {dimension_numbers = #tpu.dot_dimension_numbers<[1], [0], [0], [1], [0, 0, 1, 1], [], []>} : vector<8x64xf32>, vector<64x32xf32>, vector<8x32xf32> -> vector<8x32xf32>
    %c0_9 = arith.constant 0 : index
    %c0_10 = arith.constant 0 : index
    %10 = vector.load %arg5[%c0_9, %c0_10] : memref<1x32xf32, #tpu.memory_space<vmem>>, vector<1x32xf32>
    %11 = vector.broadcast %10 : vector<1x32xf32> to vector<8x32xf32>
    %12 = arith.addf %9, %11 : vector<8x32xf32>
    %cst_11 = arith.constant 0.000000e+00 : f32
    %13 = vector.broadcast %cst_11 : f32 to vector<8x32xf32>
    %14 = arith.maximumf %12, %13 : vector<8x32xf32>
    %c0_12 = arith.constant 0 : index
    %c0_13 = arith.constant 0 : index
    %15 = vector.load %arg6[%c0_12, %c0_13] : memref<1x32xf32, #tpu.memory_space<vmem>>, vector<1x32xf32>
    %16 = vector.broadcast %15 : vector<1x32xf32> to vector<8x32xf32>
    %17 = arith.mulf %14, %16 : vector<8x32xf32>
    %cst_14 = arith.constant dense<0.000000e+00> : vector<8xf32>
    %18 = vector.multi_reduction <add>, %17, %cst_14 [1] : vector<8x32xf32> to vector<8xf32>
    %19 = vector.shape_cast %18 : vector<8xf32> to vector<8x1xf32>
    %c0_15 = arith.constant 0 : index
    %c0_16 = arith.constant 0 : index
    %20 = vector.load %arg7[%c0_15, %c0_16] : memref<1x1xf32, #tpu.memory_space<vmem>>, vector<1x1xf32>
    %21 = vector.broadcast %20 : vector<1x1xf32> to vector<8x1xf32>
    %22 = arith.addf %19, %21 : vector<8x1xf32>
    %23 = math.absf %22 : vector<8x1xf32>
    %cst_17 = arith.constant 0.000000e+00 : f32
    %24 = vector.broadcast %cst_17 : f32 to vector<8x1xf32>
    %25 = arith.subf %24, %23 : vector<8x1xf32>
    %26 = math.exp %25 : vector<8x1xf32>
    %cst_18 = arith.constant 0.000000e+00 : f32
    %27 = vector.broadcast %cst_18 : f32 to vector<8x1xf32>
    %28 = arith.cmpf oge, %22, %27 : vector<8x1xf32>
    %cst_19 = arith.constant 1.000000e+00 : f32
    %29 = vector.broadcast %cst_19 : f32 to vector<8x1xf32>
    %30 = arith.addf %29, %26 : vector<8x1xf32>
    %cst_20 = arith.constant 1.000000e+00 : f32
    %31 = vector.broadcast %cst_20 : f32 to vector<8x1xf32>
    %32 = arith.divf %31, %30 : vector<8x1xf32>
    %cst_21 = arith.constant 1.000000e+00 : f32
    %33 = vector.broadcast %cst_21 : f32 to vector<8x1xf32>
    %34 = arith.addf %33, %26 : vector<8x1xf32>
    %35 = arith.divf %26, %34 : vector<8x1xf32>
    %36 = arith.select %28, %32, %35 : vector<8x1xi1>, vector<8x1xf32>
    %c0_22 = arith.constant 0 : index
    %c0_23 = arith.constant 0 : index
    %37 = vector.load %arg8[%c0_22, %c0_23] : memref<8x1xf32, #tpu.memory_space<vmem>>, vector<8x1xf32>
    tpu.vector_store %arg8[%c0_22, %c0_23], %36 {strides = array<i32>} : memref<8x1xf32, #tpu.memory_space<vmem>>, vector<8x1xf32>,
    return
  }
  func.func @transform_0(%arg0: i32) -> (i32, i32) {
    %c0_i32 = arith.constant 0 : i32
    %c0_i32_0 = arith.constant 0 : i32
    return %arg0, %c0_i32 : i32, i32
  }
  func.func @transform_1(%arg0: i32) -> (i32, i32) {
    %c0_i32 = arith.constant 0 : i32
    %c0_i32_0 = arith.constant 0 : i32
    %c0_i32_1 = arith.constant 0 : i32
    return %c0_i32, %c0_i32_0 : i32, i32
  }
  func.func @transform_2(%arg0: i32) -> (i32, i32) {
    %c0_i32 = arith.constant 0 : i32
    %c0_i32_0 = arith.constant 0 : i32
    %c0_i32_1 = arith.constant 0 : i32
    return %c0_i32, %c0_i32_0 : i32, i32
  }
  func.func @transform_3(%arg0: i32) -> (i32, i32) {
    %c0_i32 = arith.constant 0 : i32
    %c0_i32_0 = arith.constant 0 : i32
    %c0_i32_1 = arith.constant 0 : i32
    return %c0_i32, %c0_i32_0 : i32, i32
  }
  func.func @transform_4(%arg0: i32) -> (i32, i32) {
    %c0_i32 = arith.constant 0 : i32
    %c0_i32_0 = arith.constant 0 : i32
    %c0_i32_1 = arith.constant 0 : i32
    return %c0_i32, %c0_i32_0 : i32, i32
  }
  func.func @transform_5(%arg0: i32) -> (i32, i32) {
    %c0_i32 = arith.constant 0 : i32
    %c0_i32_0 = arith.constant 0 : i32
    %c0_i32_1 = arith.constant 0 : i32
    return %c0_i32, %c0_i32_0 : i32, i32
  }
  func.func @transform_6(%arg0: i32) -> (i32, i32) {
    %c0_i32 = arith.constant 0 : i32
    %c0_i32_0 = arith.constant 0 : i32
    %c0_i32_1 = arith.constant 0 : i32
    return %c0_i32, %c0_i32_0 : i32, i32
  }
  func.func @transform_7(%arg0: i32) -> (i32, i32) {
    %c0_i32 = arith.constant 0 : i32
    %c0_i32_0 = arith.constant 0 : i32
    return %arg0, %c0_i32 : i32, i32
  }
}

</mosaic_0001>

<bundles_post_ra>
// kernel: tpu_custom_call.1
= control target key start
LH: loop header
LB: loop body
LE: loop exit
PB: predicated region body
PF: predicated region fallthrough
CT: control target
= control target key end

     0   :  { %v315_v0 = vmov 0.0|0.0   ;;  %vm316_vm0 = vmmov 0   ;;  %v317_v4 = vmov 0.0   ;;  %vm40_vm1 = vcmask 261120   ;;  %s414_s1 = inlined_call_operand.vmem [shape: f32[32,64], index: 1, kind: input, shape index: {}]   ;;  %s415_s3 = inlined_call_operand.vmem [shape: f32[64,32], index: 3, kind: input, shape index: {}]   ;;  %s416_s0 = inlined_call_operand.vmem [shape: f32[8,32], index: 0, kind: input, shape index: {}]   ;;  %s417_s2 = inlined_call_operand.vmem [shape: f32[1,64], index: 2, kind: input, shape index: {}]   ;;  %s418_s6 = inlined_call_operand.<no memory space> [shape: f32[1,1], index: 6, kind: input, shape index: {}]   ;;  %s419_s4 = inlined_call_operand.vmem [shape: f32[1,32], index: 4, kind: input, shape index: {}]   ;;  %s420_s5 = inlined_call_operand.vmem [shape: f32[1,32], index: 5, kind: input, shape index: {}]   ;;  %s421_s7 = inlined_call_operand.vmem [shape: f32[8,1], index: 7, kind: output, shape index: {}]  }
   0x1   :  { %290 = vmatprep.subr.bf16.mxu0 %v315_v0  ;;  %v29_v1 = vld [vmem:[%s414_s1] sm:$0xff]  ;;  %v30_v2 = vld [vmem:[%s414_s1 + $0x8] sm:$0xff]  ;;  %v31_v3 = vld [vmem:[%s414_s1 + $0x10] sm:$0xff]  ;;  %268 = vmatprep.mubr.msk.f32.mxu0 %vm316_vm0, %v317_v4  ;;  %vm130_vm2 = vcmask 523264   ;;  %v12_v26 = vstv %s418_s6  ;;  %vm234_vm3 = vcmask 7168  }
   0x2   :  { %v291_v5 = vpack.c.bf16 %v30_v2, %v29_v1  ;;  %v32_v6 = vld [vmem:[%s414_s1 + $0x18] sm:$0xff]  ;;  %296 = vmatprep.subr.bf16.mxu1 %v315_v0  ;;  %v115_v7 = vld [vmem:[%s415_s3] sm:$0xff]  ;;  %287 = vmatprep.mubr.msk.f32.mxu1 %vm316_vm0, %v317_v4  ;;  %v116_v8 = vld [vmem:[%s415_s3 + $0x8] sm:$0xff]  ;;  %13 = vst [vmem:[#allocation2] sm:$0x1] %v12_v26 }
   0x3   :  { %v117_v9 = vld [vmem:[%s415_s3 + $0x10] sm:$0xff]  ;;  %v118_v10 = vld [vmem:[%s415_s3 + $0x18] sm:$0xff]  ;;  %v294_v11 = vpack.c.bf16 %v32_v6, %v31_v3  ;;  %v297_v12 = vpack.c.bf16 %v116_v8, %v115_v7  ;;  %v119_v14 = vld [vmem:[%s415_s3 + $0x20] sm:$0xff] }
   0x4   :  { %292 = vmatpush3.bf16.msra.mxu0 %v291_v5  ;;  %v300_v13 = vpack.c.bf16 %v118_v10, %v117_v9  ;;  %v120_v15 = vld [vmem:[%s415_s3 + $0x28] sm:$0xff]  ;;  %v28_v16 = vld [vmem:[%s416_s0] sm:$0xff]  ;;  %v121_v18 = vld [vmem:[%s415_s3 + $0x30] sm:$0xff] }
   0x5   :  { %293 = vmatprep.subr.bf16.mxu0 %v315_v0  ;;  %298 = vmatpush3.bf16.msra.mxu1 %v297_v12  ;;  %v303_v17 = vpack.c.bf16 %v120_v15, %v119_v14  ;;  %v122_v19 = vld [vmem:[%s415_s3 + $0x38] sm:$0xff]  ;;  %v240_v21 = vld [vmem:[%s417_s2] ss:$0 sm:$0xff] }
   0x6   :  { %299 = vmatprep.subr.bf16.mxu1 %v315_v0  ;;  %v306_v20 = vpack.c.bf16 %v122_v19, %v121_v18  ;;  %v242_v27 = vld [vmem:[%s419_s4] ss:$0 sm:$0xff] }
   0x7   :  { %v244_v31 = vld [vmem:[%s420_s5] ss:$0 sm:$0xff] }
   0x8   :  { %295 = vmatpush3.bf16.msra.mxu0 %v294_v11 }
   0x9   :  { %301 = vmatpush3.bf16.msra.mxu1 %v300_v13  ;;  %v245_v35 = vld [vmem:[#allocation2] ss:$0 sm:$0xff] }
   0xa   :  { %302 = vmatprep.subr.bf16.mxu1 %v315_v0 }
   0xb   :  { %269 = vmatmul.mubr.msk.f32.vlgmr.msra.gmra.mrb[0].mxu0 %vm40_vm1, %v28_v16 }
   0xd   :  { %304 = vmatpush3.bf16.msra.mxu1 %v303_v17 }
   0xe   :  { %305 = vmatprep.subr.bf16.mxu1 %v315_v0 }
  0x11   :  { %307 = vmatpush3.bf16.msra.mxu1 %v306_v20 }
  0xde   :  { %v110_v22 = vpop.f32.mrb[0].mxu0 }
  0xdf   :  { %v111_v23 = vadd.f32 %v240_v21, %v110_v22  ;;  %v270_v24 = vpop.f32.mrb[1].mxu0 }
  0xe1   :  { %v114_v25 = vmax.f32 %v111_v23, 0.0 }
  0xe3   :  { %288 = vmatmul.mubr.msk.f32.vlgmr.msra.gmra.mrb[0].mxu1 %vm130_vm2, %v114_v25 }
 0x1b6   :  { %v200_v28 = vpop.f32.mrb[0].mxu1 }
 0x1b7   :  { %v201_v29 = vadd.f32 %v242_v27, %v200_v28  ;;  %v289_v30 = vpop.f32.mrb[1].mxu1 }
 0x1b9   :  { %v204_v32 = vmax.f32 %v201_v29, 0.0 }
 0x1bb   :  { %v212_v33 = vmul.f32 %v244_v31, %v204_v32 }
 0x1bd   :  { %v213_v34 = vsel %vm40_vm1, %v212_v33, 0.0 }
 0x1be   :  { %214 = vadd.xlane.f32.xlu0 %v213_v34 }
 0x24b   :  { %v215_v36 = vpop.xlane.xlu0 %214 }
 0x24c   :  { %v223_v37 = vadd.f32 %v245_v35, %v215_v36 }
 0x24e   :  { %v224_v38 = vand.u32 2147483647, %v223_v37  ;;  %vm228_vm4 = vcmp.ge.f32.partialorder %v223_v37, 0.0 }
 0x250   :  { %v225_v39 = vsub.f32 0.0, %v224_v38 }
 0x252   :  { %v226_v40 = vmul.f32 1.442695, %v225_v39 }
 0x254   :  { %311 = vpow2.f32 %v226_v40 }
 0x25e   :  { %v312_v41 = vpop.eup %311 }
 0x25f   :  { %v229_v42 = vadd.f32 1.0, %v312_v41 }
 0x261   :  { %313 = vrcp.f32 %v229_v42 }
 0x26b   :  { %v314_v43 = vpop.eup %313 }
 0x26c   :  { %v232_v44 = vmul.f32 %v314_v43, %v312_v41 }
 0x26e   :  { %v233_v45 = vsel %vm228_vm4, %v314_v43, %v232_v44 }
 0x26f   :  { %235 = vst.msk [vmem:[%s421_s7] sm:$0xff] %vm234_vm3, %v233_v45 }

</bundles_post_ra>
